<compile_context>
chip_gen: v5e
topology: v5e:2x2
jax: 0.10.0
libtpu: 0.0.40
codegen_flags: <defaults>
</compile_context>

<pallas_src>
import functools

import jax
import jax.numpy as jnp
from jax.experimental import pallas as pl
from jax.experimental.pallas import tpu as pltpu


def _round_up(x, m):
    return ((x + m - 1) // m) * m


def _matmul_kernel(a_ref, b_ref, o_ref, acc_ref):
    """Tiled matmul body: accumulate over the K grid axis (last, 'arbitrary')."""

    @pl.when(pl.program_id(2) == 0)
    def _():
        acc_ref[...] = jnp.zeros_like(acc_ref)

    acc_ref[...] += jnp.dot(
        a_ref[...], b_ref[...], preferred_element_type=jnp.float32
    )

    @pl.when(pl.program_id(2) == pl.num_programs(2) - 1)
    def _():
        o_ref[...] = acc_ref[...].astype(o_ref.dtype)


@functools.partial(
    jax.jit, static_argnames=("tm", "tn", "tk", "cast_to_bf16")
)
def smooth_quant_matmul(a, b, *, tm=None, tn=None, tk=None, cast_to_bf16=False):
    """Pallas equivalent of SmoothQuantMatMul.forward(input1, input2)."""
    M, K = a.shape
    K2, N = b.shape
    assert K == K2, "inner dimensions must match"

    out_dtype = jnp.result_type(a.dtype, b.dtype)

    # Optional bf16 MXU path (opt-in; keeps f32 accumulation).
    if cast_to_bf16:
        a = a.astype(jnp.bfloat16)
        b = b.astype(jnp.bfloat16)

    # -------- MXU / VMEM-aware tile selection (clamped to padded dims) -------
    # tm multiple of 8 (sublane), tn/tk multiples of 128 (lane / MXU width).
    tm = min(512, _round_up(M, 8)) if tm is None else tm
    tn = min(1024, _round_up(N, 128)) if tn is None else tn
    tk = min(512, _round_up(K, 128)) if tk is None else tk
    assert tm % 8 == 0 and tn % 128 == 0 and tk % 128 == 0

    # -------- Pad so every dim is an exact multiple of its tile --------------
    Mp = _round_up(M, tm)
    Np = _round_up(N, tn)
    Kp = _round_up(K, tk)
    if (Mp, Kp) != (M, K):
        a = jnp.pad(a, ((0, Mp - M), (0, Kp - K)))
    if (Kp, Np) != (K, N):
        b = jnp.pad(b, ((0, Kp - K), (0, Np - N)))

    grid = (Mp // tm, Np // tn, Kp // tk)

    # -------- Explicit VMEM budget (double-buffered in/out + f32 acc) --------
    a_bytes = jnp.dtype(a.dtype).itemsize
    b_bytes = jnp.dtype(b.dtype).itemsize
    o_bytes = jnp.dtype(out_dtype).itemsize
    vmem_budget = (
        2 * (tm * tk * a_bytes + tk * tn * b_bytes)  # double-buffered inputs
        + tm * tn * 4                                # f32 accumulator scratch
        + 2 * tm * tn * o_bytes                      # double-buffered output
    )
    vmem_limit = min(max(int(vmem_budget * 1.5), 32 * 1024 * 1024),
                     48 * 1024 * 1024)               # safe on v7x (64 MiB phys)

    cost = pl.CostEstimate(
        flops=2 * M * N * K,
        transcendentals=0,
        bytes_accessed=M * K * a_bytes + K * N * b_bytes + M * N * o_bytes,
    )

    out_padded = pl.pallas_call(
        _matmul_kernel,
        out_shape=jax.ShapeDtypeStruct((Mp, Np), out_dtype),
        grid_spec=pltpu.PrefetchScalarGridSpec(
            num_scalar_prefetch=0,
            grid=grid,
            in_specs=[
                pl.BlockSpec((tm, tk), lambda i, j, k: (i, k)),
                pl.BlockSpec((tk, tn), lambda i, j, k: (k, j)),
            ],
            out_specs=pl.BlockSpec((tm, tn), lambda i, j, k: (i, j)),
            scratch_shapes=[pltpu.VMEM((tm, tn), jnp.float32)],
        ),
        compiler_params=pltpu.CompilerParams(
            dimension_semantics=("parallel", "parallel", "arbitrary"),
            vmem_limit_bytes=vmem_limit,
        ),
        cost_estimate=cost,
    )(a, b)

    # Slice back to the logical (M, N) result.
    if (Mp, Np) != (M, N):
        out_padded = out_padded[:M, :N]
    return out_padded


if __name__ == "__main__":
    # Small shapes implied by forward(input1, input2): seq=8, hidden=32, out=16.
    key = jax.random.PRNGKey(0)
    k1, k2 = jax.random.split(key)
    input1 = jax.random.normal(k1, (8, 32), dtype=jnp.float32)   # (M, K)
    input2 = jax.random.normal(k2, (32, 16), dtype=jnp.float32)  # (K, N)

    out = smooth_quant_matmul(input1, input2)
    out = jax.block_until_ready(out)

    ref = jnp.matmul(input1, input2)
    assert out.shape == ref.shape
    assert jnp.allclose(out, ref, atol=1e-4, rtol=1e-4)

    print("KERNEL_OK")
</pallas_src>

<mosaic_0001>
module attributes {stable_mosaic.version = 11 : i64} {
  func.func @_matmul_kernel(%arg0: i32, %arg1: i32, %arg2: i32, %arg3: memref<8x128xf32, #tpu.memory_space<vmem>>, %arg4: memref<128x128xf32, #tpu.memory_space<vmem>>, %arg5: memref<8x128xf32, #tpu.memory_space<vmem>>, %arg6: memref<8x128xf32, #tpu.memory_space<vmem>>) attributes {dimension_semantics = [#tpu.dimension_semantics<parallel>, #tpu.dimension_semantics<parallel>, #tpu.dimension_semantics<arbitrary>], iteration_bounds = array<i64: 1, 1, 1>, scalar_prefetch = 0 : i64, scratch_operands = 1 : i64, tpu.core_type = #tpu.core_type<tc>, window_params = [{transform_indices = @transform_0, window_bounds = array<i64: 8, 128>}, {transform_indices = @transform_1, window_bounds = array<i64: 128, 128>}, {transform_indices = @transform_2, window_bounds = array<i64: 8, 128>}]} {
    %c0_i32 = arith.constant 0 : i32
    %0 = arith.cmpi eq, %arg2, %c0_i32 : i32
    %1 = arith.extui %0 : i1 to i32
    %c0_i32_0 = arith.constant 0 : i32
    %2 = arith.cmpi ne, %1, %c0_i32_0 : i32
    scf.if %2 {
      %cst_10 = arith.constant 0.000000e+00 : f32
      %12 = vector.broadcast %cst_10 : f32 to vector<8x128xf32>
      %c0_11 = arith.constant 0 : index
      %c0_12 = arith.constant 0 : index
      %13 = vector.load %arg6[%c0_11, %c0_12] : memref<8x128xf32, #tpu.memory_space<vmem>>, vector<8x128xf32>
      tpu.vector_store %arg6[%c0_11, %c0_12], %12 {strides = array<i32>} : memref<8x128xf32, #tpu.memory_space<vmem>>, vector<8x128xf32>,
    } else {
    }
    %c0 = arith.constant 0 : index
    %c0_1 = arith.constant 0 : index
    %3 = vector.load %arg6[%c0, %c0_1] : memref<8x128xf32, #tpu.memory_space<vmem>>, vector<8x128xf32>
    %c0_2 = arith.constant 0 : index
    %c0_3 = arith.constant 0 : index
    %4 = vector.load %arg3[%c0_2, %c0_3] : memref<8x128xf32, #tpu.memory_space<vmem>>, vector<8x128xf32>
    %c0_4 = arith.constant 0 : index
    %c0_5 = arith.constant 0 : index
    %5 = vector.load %arg4[%c0_4, %c0_5] : memref<128x128xf32, #tpu.memory_space<vmem>>, vector<128x128xf32>
    %cst = arith.constant dense<0.000000e+00> : vector<8x128xf32>
    %6 = tpu.matmul %4, %5, %cst {dimension_numbers = #tpu.dot_dimension_numbers<[1], [0], [0], [1], [0, 0, 1, 1], [], []>} : vector<8x128xf32>, vector<128x128xf32>, vector<8x128xf32> -> vector<8x128xf32>
    %7 = arith.addf %3, %6 : vector<8x128xf32>
    %c0_6 = arith.constant 0 : index
    %c0_7 = arith.constant 0 : index
    %8 = vector.load %arg6[%c0_6, %c0_7] : memref<8x128xf32, #tpu.memory_space<vmem>>, vector<8x128xf32>
    tpu.vector_store %arg6[%c0_6, %c0_7], %7 {strides = array<i32>} : memref<8x128xf32, #tpu.memory_space<vmem>>, vector<8x128xf32>,
    %c0_i32_8 = arith.constant 0 : i32
    %9 = arith.cmpi eq, %arg2, %c0_i32_8 : i32
    %10 = arith.extui %9 : i1 to i32
    %c0_i32_9 = arith.constant 0 : i32
    %11 = arith.cmpi ne, %10, %c0_i32_9 : i32
    scf.if %11 {
      %c0_10 = arith.constant 0 : index
      %c0_11 = arith.constant 0 : index
      %12 = vector.load %arg6[%c0_10, %c0_11] : memref<8x128xf32, #tpu.memory_space<vmem>>, vector<8x128xf32>
      %c0_12 = arith.constant 0 : index
      %c0_13 = arith.constant 0 : index
      %13 = vector.load %arg5[%c0_12, %c0_13] : memref<8x128xf32, #tpu.memory_space<vmem>>, vector<8x128xf32>
      tpu.vector_store %arg5[%c0_12, %c0_13], %12 {strides = array<i32>} : memref<8x128xf32, #tpu.memory_space<vmem>>, vector<8x128xf32>,
    } else {
    }
    return
  }
  func.func @transform_0(%arg0: i32, %arg1: i32, %arg2: i32) -> (i32, i32) {
    %c0_i32 = arith.constant 0 : i32
    return %arg0, %arg2 : i32, i32
  }
  func.func @transform_1(%arg0: i32, %arg1: i32, %arg2: i32) -> (i32, i32) {
    %c0_i32 = arith.constant 0 : i32
    return %arg2, %arg1 : i32, i32
  }
  func.func @transform_2(%arg0: i32, %arg1: i32, %arg2: i32) -> (i32, i32) {
    %c0_i32 = arith.constant 0 : i32
    return %arg0, %arg1 : i32, i32
  }
}

</mosaic_0001>

<bundles_post_ra>
// kernel: smooth_quant_matmul.1
= control target key start
LH: loop header
LB: loop body
LE: loop exit
PB: predicated region body
PF: predicated region fallthrough
CT: control target
= control target key end

     0   :  { %s175_s0 = inlined_call_operand.vmem [shape: f32[8,128], index: 0, kind: input, shape index: {}]   ;;  %s176_s1 = inlined_call_operand.vmem [shape: f32[128,128], index: 1, kind: input, shape index: {}]   ;;  %s177_s2 = inlined_call_operand.hbm [shape: f32[8,128], index: 2, kind: output, shape index: {}]  }
   0x1   :  { %v34_v0 = vld [vmem:[%s176_s1 + $0x78] sm:$0xff]  ;;  %v33_v1 = vld [vmem:[%s176_s1 + $0x70] sm:$0xff]  ;;  %v32_v2 = vld [vmem:[%s176_s1 + $0x68] sm:$0xff] }
   0x2   :  { %35 = vmatpush.msra.mxu0 %v34_v0  ;;  %v31_v3 = vld [vmem:[%s176_s1 + $0x60] sm:$0xff] }
   0x4   :  { %36 = vmatpush.msra.mxu0 %v33_v1 }
   0x6   :  { %37 = vmatpush.msra.mxu0 %v32_v2 }
   0x7   :  { %7 = vsyncpa [#allocation4], 0  ;;  %v30_v4 = vld [vmem:[%s176_s1 + $0x58] sm:$0xff]  ;;  %v29_v5 = vld [vmem:[%s176_s1 + $0x50] sm:$0xff]  ;;  %s105_s15 = smov [#allocation3]   ;;  %s69_s19 = sshll.u32 %s177_s2, 4  ;;  %s70_s19 = int_to_ptr.hbm [resolvable:$true] %s69_s19 }
   0x8   :  { %38 = vmatpush.msra.mxu0 %v31_v3  ;;  %v28_v6 = vld [vmem:[%s176_s1 + $0x48] sm:$0xff]  ;;  %v27_v7 = vld [vmem:[%s176_s1 + $0x40] sm:$0xff]  ;;  %v26_v8 = vld [vmem:[%s176_s1 + $0x38] sm:$0xff]  ;;  %s67_s16 = sshll.u32 %s105_s15, 4  ;;  %s68_s16 = int_to_ptr.vmem [resolvable:$true] %s67_s16 }
   0x9   :  { %v25_v9 = vld [vmem:[%s176_s1 + $0x30] sm:$0xff]  ;;  %v24_v10 = vld [vmem:[%s176_s1 + $0x28] sm:$0xff]  ;;  %v23_v11 = vld [vmem:[%s176_s1 + $0x20] sm:$0xff] }
   0xa   :  { %39 = vmatpush.msra.mxu0 %v30_v4  ;;  %v22_v12 = vld [vmem:[%s176_s1 + $0x18] sm:$0xff]  ;;  %v21_v13 = vld [vmem:[%s176_s1 + $0x10] sm:$0xff]  ;;  %v20_v14 = vld [vmem:[%s176_s1 + $0x8] sm:$0xff] }
   0xb   :  { %v19_v15 = vld [vmem:[%s176_s1] sm:$0xff] }
   0xc   :  { %40 = vmatpush.msra.mxu0 %v29_v5  ;;  %v18_v16 = vld [vmem:[%s175_s0] sm:$0xff] }
   0xe   :  { %41 = vmatpush.msra.mxu0 %v28_v6 }
  0x10   :  { %42 = vmatpush.msra.mxu0 %v27_v7 }
  0x12   :  { %43 = vmatpush.msra.mxu0 %v26_v8 }
  0x14   :  { %44 = vmatpush.msra.mxu0 %v25_v9 }
  0x16   :  { %45 = vmatpush.msra.mxu0 %v24_v10 }
  0x18   :  { %46 = vmatpush.msra.mxu0 %v23_v11 }
  0x1a   :  { %47 = vmatpush.msra.mxu0 %v22_v12 }
  0x1c   :  { %48 = vmatpush.msra.mxu0 %v21_v13 }
  0x1e   :  { %49 = vmatpush.msra.mxu0 %v20_v14 }
  0x20   :  { %50 = vmatpush.msra.mxu0 %v19_v15 }
  0x21   :  { %51 = vmatmul.f32.vlgmr.msra.gmra.mxu0 %v18_v16 }
  0x9e   :  { %v52_v17 = vpop.f32.mrf.mxu0 }
  0x9f   :  { %61 = vst [vmem:[#allocation3] sm:$0xff] %v52_v17 }
  0xa0   :  { %72 = dma.vmem_to_hbm [thread:$0]  %s68_s16, 128, %s70_s19, [#allocation4]  }
  0xa1   :  { %103 = dma.done.wait [#allocation4], 128  }
  0xa2   :  { %104 = vsyncadd [#allocation4], 4294967168 }
  0xa3   :  { %77 = vsyncpa [#allocation4], 1 }

</bundles_post_ra>
